<compile_context>
chip_gen: v5e
topology: v5e:2x2
jax: 0.10.0
libtpu: 0.0.40
codegen_flags: <defaults>
</compile_context>

<pallas_src>
import functools
import math

import numpy as np

import jax
import jax.numpy as jnp
from jax.experimental import pallas as pl
from jax.experimental.pallas import tpu as pltpu

_EPS = 1e-5


# ---------------------------------------------------------------------------
# import-time hardware facts (conservative fallbacks if queries fail)
# ---------------------------------------------------------------------------
def _chip_config():
    kind = ""
    try:
        kind = jax.devices()[0].device_kind.lower()
    except Exception:
        pass
    vmem = None
    try:
        vmem = int(pltpu.get_tpu_info().vmem_capacity_bytes)
    except Exception:
        pass
    is_v7 = "v7" in kind
    is_v5e = "v5e" in kind or ("v5" in kind and "lite" in kind)
    if not vmem:
        vmem = (64 << 20) if is_v7 else (128 << 20)
    return dict(
        # leave headroom below physical VMEM for the compiler
        vmem_limit=int(min((vmem * 3) // 4, 100 << 20)),
        tile_budget=vmem // 2,
        num_cores=2 if is_v7 else 1,                      # TensorCores per chip
        packed_cap=256 if is_v5e else 512,                # max packed row width P
        stats_precision=(jax.lax.Precision.HIGH if is_v5e
                         else jax.lax.Precision.HIGHEST),
    )


_CFG = _chip_config()


# ---------------------------------------------------------------------------
# kernels
# ---------------------------------------------------------------------------
def _ln_kernel(x_ref, w_ref, b_ref, o_ref):
    """General path: (rows, C) tile, normalize over the last axis."""
    x = x_ref[...].astype(jnp.float32)
    inv_c = 1.0 / x.shape[-1]
    mu = jnp.sum(x, axis=-1, keepdims=True) * inv_c
    ex2 = jnp.sum(x * x, axis=-1, keepdims=True) * inv_c
    inv = jax.lax.rsqrt(ex2 - mu * mu + _EPS)
    o_ref[...] = ((x - mu) * inv * w_ref[...] + b_ref[...]).astype(o_ref.dtype)


def _ln_packed_kernel(x_ref, w_ref, b_ref, avg_ref, o_ref, *, precision):
    """Lane-packed path: each tile row holds k original rows (width P = k*C).

    avg_ref is a (P, P) block-diagonal matrix with 1/C inside each CxC
    diagonal block, so `x @ avg` gives every lane the mean of its own C-wide
    segment via the (otherwise idle) MXU -- no cross-lane shuffles, and all
    loads / stores are fully 128-lane dense.
    """
    x = x_ref[...].astype(jnp.float32)
    a = avg_ref[...]
    mu = jnp.dot(x, a, preferred_element_type=jnp.float32, precision=precision)
    ex2 = jnp.dot(x * x, a, preferred_element_type=jnp.float32, precision=precision)
    inv = jax.lax.rsqrt(ex2 - mu * mu + _EPS)
    o_ref[...] = ((x - mu) * inv * w_ref[...] + b_ref[...]).astype(o_ref.dtype)


# ---------------------------------------------------------------------------
# tiling
# ---------------------------------------------------------------------------
def _pick_tile_rows(n_rows, row_width, in_isz, out_isz):
    budget = _CFG["tile_budget"]
    num_cores = _CFG["num_cores"]
    pack = max(8, 32 // max(in_isz, 1))  # native sublane packing: 8 f32 / 16 bf16 / 32 i8

    # Per-row VMEM: double-buffered input + output tiles plus ~2 live f32
    # full-tile intermediates (single-pass statistics).
    row_bytes = row_width * (2 * in_isz + 2 * out_isz + 2 * 4)
    vmem_tile = budget // max(row_bytes, 1)
    # ~8 MiB per input tile is well past the measured HBM-roofline plateau.
    plateau_tile = (8 << 20) // max(row_width * in_isz, 1)
    tile = max(pack, min(vmem_tile, plateau_tile))

    # Keep just enough grid steps to pipeline (2 on single-TC v5e/v6e, 4 on
    # dual-TC v7x) — but never shrink below ~1 MiB of input per tile.
    min_steps = 2 * num_cores
    floor_tile = max(pack, (1 << 20) // max(row_width * in_isz, 1))
    steps_tile = pl.cdiv(n_rows, min_steps)
    if steps_tile >= floor_tile:
        tile = min(tile, steps_tile)

    if tile >= n_rows:
        return n_rows
    tile = max(pack, (tile // pack) * pack)
    if num_cores > 1 and tile > pack:
        # best-effort even step count so both v7x TensorCores get equal work
        steps = pl.cdiv(n_rows, tile)
        if steps % 2 and pl.cdiv(n_rows, tile - pack) % 2 == 0:
            tile -= pack
    return min(tile, n_rows)


# ---------------------------------------------------------------------------
# pallas_call wrappers
# ---------------------------------------------------------------------------
def _ln_call(kernel, x2d, extra_inputs, extra_specs):
    R, W = x2d.shape
    tile = _pick_tile_rows(R, W, x2d.dtype.itemsize, x2d.dtype.itemsize)
    grid = (pl.cdiv(R, tile),)  # partial tail block is masked; no host-side pad
    row_spec = pl.BlockSpec((tile, W), lambda i: (i, 0))
    return pl.pallas_call(
        kernel,
        out_shape=jax.ShapeDtypeStruct((R, W), x2d.dtype),
        grid_spec=pltpu.PrefetchScalarGridSpec(
            num_scalar_prefetch=0,
            grid=grid,
            in_specs=[row_spec] + extra_specs,
            out_specs=row_spec,
        ),
        compiler_params=pltpu.CompilerParams(
            dimension_semantics=("parallel",),
            vmem_limit_bytes=int(_CFG["vmem_limit"]),
        ),
    )(x2d, *extra_inputs)


def _layernorm_2d(x2d, w_f32, b_f32):
    C = x2d.shape[1]
    specs = [pl.BlockSpec((1, C), lambda i: (0, 0)),
             pl.BlockSpec((1, C), lambda i: (0, 0))]
    return _ln_call(_ln_kernel, x2d,
                    (w_f32.reshape(1, C), b_f32.reshape(1, C)), specs)


@functools.lru_cache(maxsize=None)
def _avg_matrix(C, k):
    """(P, P) block-diagonal matrix with 1/C in each CxC diagonal block."""
    P = k * C
    seg = np.arange(P) // C
    return np.equal.outer(seg, seg).astype(np.float32) * np.float32(1.0 / C)


def _layernorm_2d_packed(x2d, w_f32, b_f32, k):
    R, C = x2d.shape
    P = k * C
    pad = (-R) % k
    if pad:                                   # keep the packed path for R % k != 0
        x2d = jnp.pad(x2d, ((0, pad), (0, 0)))
    xp = x2d.reshape((R + pad) // k, P)       # free row-major reshape
    avg = jnp.asarray(_avg_matrix(C, k))      # cached numpy -> jit constant
    wp = jnp.tile(w_f32, k).reshape(1, P)
    bp = jnp.tile(b_f32, k).reshape(1, P)
    specs = [pl.BlockSpec((1, P), lambda i: (0, 0)),
             pl.BlockSpec((1, P), lambda i: (0, 0)),
             pl.BlockSpec((P, P), lambda i: (0, 0))]
    kernel = functools.partial(_ln_packed_kernel,
                               precision=_CFG["stats_precision"])
    yp = _ln_call(kernel, xp, (wp, bp, avg), specs)
    y2d = yp.reshape(R + pad, C)
    return y2d[:R] if pad else y2d


@jax.jit
def withbias_layernorm(x, weight, bias):
    """LayerNorm over the last axis of `x` (any leading dims), with bias.

    Matches PyTorch WithBias_LayerNorm: biased variance, eps=1e-5, f32 math.
    Path selection (lane-packed small-C vs. general) is static at trace time.
    """
    C = x.shape[-1]
    lead = x.shape[:-1]
    x2d = x.reshape(-1, C)
    R = x2d.shape[0]
    w_f32 = weight.astype(jnp.float32).reshape(-1)
    b_f32 = bias.astype(jnp.float32).reshape(-1)

    # Lane-pack small C so every load/store is 128-lane dense (P = lcm(C, 128)).
    k = 128 // math.gcd(C, 128)
    if k > 1 and k * C <= _CFG["packed_cap"] and R >= k:
        y2d = _layernorm_2d_packed(x2d, w_f32, b_f32, k)
    else:
        y2d = _layernorm_2d(x2d, w_f32, b_f32)
    return y2d.reshape(*lead, C)


# ---------------------------------------------------------------------------
# reference + smoke test
# ---------------------------------------------------------------------------
def _reference(x, weight, bias):
    mu = jnp.mean(x, axis=-1, keepdims=True)
    sigma = jnp.mean((x - mu) ** 2, axis=-1, keepdims=True)
    return (x - mu) / jnp.sqrt(sigma + _EPS) * weight + bias


if __name__ == "__main__":
    key = jax.random.PRNGKey(0)
    k1, k2, k3, k4, k5 = jax.random.split(key, 5)

    # Case 1: module-default params (weight=1, bias=0), small hidden dim C=32
    # -> lane-packed (MXU segment-mean) path, R divisible by k.
    B, S, C = 2, 64, 32
    x = jax.random.normal(k1, (B, S, C), dtype=jnp.float32)
    weight = jnp.ones((C,), dtype=jnp.float32)
    bias = jnp.zeros((C,), dtype=jnp.float32)
    y = jax.block_until_ready(withbias_layernorm(x, weight, bias))
    y_ref = _reference(x, weight, bias)
    assert jnp.allclose(y, y_ref, atol=1e-4, rtol=1e-4), "packed-path mismatch"

    # Case 2: lane-dense hidden dim C=128 with non-trivial affine params
    # -> general (single-pass stats) path.
    B2, S2, C2 = 2, 8, 128
    x2 = jax.random.normal(k2, (B2, S2, C2), dtype=jnp.float32)
    w2 = 1.0 + 0.1 * jax.random.normal(k3, (C2,), dtype=jnp.float32)
    b2 = 0.1 * jax.random.normal(k4, (C2,), dtype=jnp.float32)
    y2 = jax.block_until_ready(withbias_layernorm(x2, w2, b2))
    y2_ref = _reference(x2, w2, b2)
    assert jnp.allclose(y2, y2_ref, atol=1e-4, rtol=1e-4), "general-path mismatch"

    # Case 3: small C with R % k != 0 -> packed path with row padding.
    B3, S3, C3 = 1, 9, 32
    x3 = jax.random.normal(k5, (B3, S3, C3), dtype=jnp.float32)
    w3 = jnp.ones((C3,), dtype=jnp.float32)
    b3 = jnp.zeros((C3,), dtype=jnp.float32)
    y3 = jax.block_until_ready(withbias_layernorm(x3, w3, b3))
    y3_ref = _reference(x3, w3, b3)
    assert jnp.allclose(y3, y3_ref, atol=1e-4, rtol=1e-4), "padded packed-path mismatch"

    print("KERNEL_OK")
</pallas_src>

<mosaic_0001>
module attributes {stable_mosaic.version = 11 : i64} {
  func.func @_ln_packed_kernel(%arg0: i32, %arg1: memref<32x128xf32, #tpu.memory_space<vmem>>, %arg2: memref<1x128xf32, #tpu.memory_space<vmem>>, %arg3: memref<1x128xf32, #tpu.memory_space<vmem>>, %arg4: memref<128x128xf32, #tpu.memory_space<vmem>>, %arg5: memref<32x128xf32, #tpu.memory_space<vmem>>) attributes {dimension_semantics = [#tpu.dimension_semantics<parallel>], iteration_bounds = array<i64: 1>, scalar_prefetch = 0 : i64, scratch_operands = 0 : i64, tpu.core_type = #tpu.core_type<tc>, window_params = [{transform_indices = @transform_0, window_bounds = array<i64: 32, 128>}, {pipeline_mode = #tpu.pipeline_mode<synchronous>, transform_indices = @transform_1, window_bounds = array<i64: 1, 128>}, {pipeline_mode = #tpu.pipeline_mode<synchronous>, transform_indices = @transform_2, window_bounds = array<i64: 1, 128>}, {pipeline_mode = #tpu.pipeline_mode<synchronous>, transform_indices = @transform_3, window_bounds = array<i64: 128, 128>}, {transform_indices = @transform_4, window_bounds = array<i64: 32, 128>}]} {
    %c0 = arith.constant 0 : index
    %c0_0 = arith.constant 0 : index
    %0 = vector.load %arg1[%c0, %c0_0] : memref<32x128xf32, #tpu.memory_space<vmem>>, vector<32x128xf32>
    %c0_1 = arith.constant 0 : index
    %c0_2 = arith.constant 0 : index
    %1 = vector.load %arg4[%c0_1, %c0_2] : memref<128x128xf32, #tpu.memory_space<vmem>>, vector<128x128xf32>
    %cst = arith.constant dense<0.000000e+00> : vector<32x128xf32>
    %2 = tpu.matmul %0, %1, %cst {dimension_numbers = #tpu.dot_dimension_numbers<[1], [0], [0], [1], [0, 0, 1, 1], [], []>, precision = #tpu.contract_precision<fp32>} : vector<32x128xf32>, vector<128x128xf32>, vector<32x128xf32> -> vector<32x128xf32>
    %3 = arith.mulf %0, %0 : vector<32x128xf32>
    %cst_3 = arith.constant dense<0.000000e+00> : vector<32x128xf32>
    %4 = tpu.matmul %3, %1, %cst_3 {dimension_numbers = #tpu.dot_dimension_numbers<[1], [0], [0], [1], [0, 0, 1, 1], [], []>, precision = #tpu.contract_precision<fp32>} : vector<32x128xf32>, vector<128x128xf32>, vector<32x128xf32> -> vector<32x128xf32>
    %5 = arith.mulf %2, %2 : vector<32x128xf32>
    %6 = arith.subf %4, %5 : vector<32x128xf32>
    %cst_4 = arith.constant 9.99999974E-6 : f32
    %7 = vector.broadcast %cst_4 : f32 to vector<32x128xf32>
    %8 = arith.addf %6, %7 : vector<32x128xf32>
    %9 = math.rsqrt %8 : vector<32x128xf32>
    %10 = arith.subf %0, %2 : vector<32x128xf32>
    %11 = arith.mulf %10, %9 : vector<32x128xf32>
    %c0_5 = arith.constant 0 : index
    %c0_6 = arith.constant 0 : index
    %12 = vector.load %arg2[%c0_5, %c0_6] : memref<1x128xf32, #tpu.memory_space<vmem>>, vector<1x128xf32>
    %13 = vector.broadcast %12 : vector<1x128xf32> to vector<32x128xf32>
    %14 = arith.mulf %11, %13 : vector<32x128xf32>
    %c0_7 = arith.constant 0 : index
    %c0_8 = arith.constant 0 : index
    %15 = vector.load %arg3[%c0_7, %c0_8] : memref<1x128xf32, #tpu.memory_space<vmem>>, vector<1x128xf32>
    %16 = vector.broadcast %15 : vector<1x128xf32> to vector<32x128xf32>
    %17 = arith.addf %14, %16 : vector<32x128xf32>
    %c0_9 = arith.constant 0 : index
    %c0_10 = arith.constant 0 : index
    %18 = vector.load %arg5[%c0_9, %c0_10] : memref<32x128xf32, #tpu.memory_space<vmem>>, vector<32x128xf32>
    tpu.vector_store %arg5[%c0_9, %c0_10], %17 {strides = array<i32>} : memref<32x128xf32, #tpu.memory_space<vmem>>, vector<32x128xf32>,
    return
  }
  func.func @transform_0(%arg0: i32) -> (i32, i32) {
    %c0_i32 = arith.constant 0 : i32
    %c0_i32_0 = arith.constant 0 : i32
    return %arg0, %c0_i32 : i32, i32
  }
  func.func @transform_1(%arg0: i32) -> (i32, i32) {
    %c0_i32 = arith.constant 0 : i32
    %c0_i32_0 = arith.constant 0 : i32
    %c0_i32_1 = arith.constant 0 : i32
    return %c0_i32, %c0_i32_0 : i32, i32
  }
  func.func @transform_2(%arg0: i32) -> (i32, i32) {
    %c0_i32 = arith.constant 0 : i32
    %c0_i32_0 = arith.constant 0 : i32
    %c0_i32_1 = arith.constant 0 : i32
    return %c0_i32, %c0_i32_0 : i32, i32
  }
  func.func @transform_3(%arg0: i32) -> (i32, i32) {
    %c0_i32 = arith.constant 0 : i32
    %c0_i32_0 = arith.constant 0 : i32
    %c0_i32_1 = arith.constant 0 : i32
    return %c0_i32, %c0_i32_0 : i32, i32
  }
  func.func @transform_4(%arg0: i32) -> (i32, i32) {
    %c0_i32 = arith.constant 0 : i32
    %c0_i32_0 = arith.constant 0 : i32
    return %arg0, %c0_i32 : i32, i32
  }
}

</mosaic_0001>

<bundles_post_ra>
// kernel: tile.14
= control target key start
LH: loop header
LB: loop body
LE: loop exit
PB: predicated region body
PF: predicated region fallthrough
CT: control target
= control target key end

     0   :  { %s37_s8 = smov 32   ;;  %s38_s9 = smov 64   ;;  %vm7_vm0 = vcmask 261120   ;;  %vm13_vm1 = vcmask 1048320   ;;  %vm19_vm2 = vcmask 785920   ;;  %vm25_vm3 = vcmask 523520   ;;  %s55_s0 = inlined_call_operand.vmem [shape: f32[4,32], index: 0, kind: input, shape index: {}]   ;;  %s56_s1 = inlined_call_operand.vmem [shape: f32[1,128], index: 1, kind: output, shape index: {}]  }
   0x1   :  { %v4_v0 = vld [vmem:[%s55_s0] sm:$0xf]  ;;  %s36_s0 = smov 96  }
   0x2   :  { %5 = vst [vmem:[#allocation1] sm:$0xf] %v4_v0 }
   0x9   :  { %v10_v1 = vld [vmem:[#allocation1 + $0x3] sm:$0x1]   ;;  %v22_v2 = vld [vmem:[#allocation1 + $0x1] sm:$0x1]   ;;  %v16_v3 = vld [vmem:[#allocation1 + $0x2] sm:$0x1]  }
   0xa   :  { %11 = vrot.lane.b32.xlu0 %v10_v1, %s36_s0  ;;  %23 = vrot.lane.b32.xlu1 %v22_v2, %s37_s8  ;;  %v6_v4 = vld [vmem:[#allocation1] sm:$0x1]  }
   0xb   :  { %8 = vst.msk [vmem:[#allocation0] sm:$0x1] %vm7_vm0, %v6_v4  }
  0x12   :  { %17 = vrot.lane.b32.xlu0 %v16_v3, %s38_s9 }
  0x7c   :  { %v12_v5 = vpop.permute.xlu0 %11   ;;  %v24_v6 = vpop.permute.xlu1 %23  }
  0x7d   :  { %14 = vst.msk [vmem:[#allocation0] sm:$0x1] %vm13_vm1, %v12_v5  }
  0x84   :  { %v18_v7 = vpop.permute.xlu0 %17  }
  0x85   :  { %20 = vst.msk [vmem:[#allocation0] sm:$0x1] %vm19_vm2, %v18_v7  }
  0x86   :  { %26 = vst.msk [vmem:[#allocation0] sm:$0x1] %vm25_vm3, %v24_v6  }
  0x8d   :  { %v29_v8 = vld [vmem:[#allocation0] sm:$0x1] }
  0x8e   :  { %32 = vst [vmem:[%s56_s1] sm:$0x1] %v29_v8 }

// kernel: tile.13
= control target key start
LH: loop header
LB: loop body
LE: loop exit
PB: predicated region body
PF: predicated region fallthrough
CT: control target
= control target key end

     0   :  { %2 = vsyncpa [#allocation1], 0  ;;  %s48_s8 = smov [#allocation0]   ;;  %s65_s0 = inlined_call_operand.hbm [shape: f32[32], index: 0, kind: input, shape index: {}]   ;;  %s66_s1 = inlined_call_operand.vmem [shape: f32[4,32], index: 1, kind: output, shape index: {}]  }
   0x1   :  { %s8_s0 = sshll.u32 %s65_s0, 4  ;;  %s10_s9 = sshll.u32 %s48_s8, 4  ;;  %s9_s0 = int_to_ptr.hbm [resolvable:$true] %s8_s0  ;;  %s11_s9 = int_to_ptr.vmem [resolvable:$true] %s10_s9 }
   0x2   :  { %13 = dma.hbm_to_vmem [thread:$0]  %s9_s0, 16, %s11_s9, [#allocation1]  }
   0x3   :  { %46 = dma.done.wait [#allocation1], 16  }
   0x4   :  { %47 = vsyncadd [#allocation1], 4294967280  ;;  %v18_v0 = vld [vmem:[#allocation0] ss:$0 sm:$0xff] }
   0x5   :  { %19 = vst [vmem:[%s66_s1] sm:$0xf] %v18_v0 }
   0x6   :  { %20 = vsyncpa [#allocation1], 1 }

// kernel: tile.18
= control target key start
LH: loop header
LB: loop body
LE: loop exit
PB: predicated region body
PF: predicated region fallthrough
CT: control target
= control target key end

     0   :  { %s22_s0 = inlined_call_operand.vmem [shape: f32[32], index: 0, kind: input, shape index: {}]   ;;  %s23_s1 = inlined_call_operand.vmem [shape: f32[4,32], index: 1, kind: output, shape index: {}]  }
   0x1   :  { %v4_v0 = vld [vmem:[%s22_s0] ss:$0 sm:$0xff] }
   0x2   :  { %5 = vst [vmem:[%s23_s1] sm:$0xf] %v4_v0 }

// kernel: withbias_layernorm.1
= control target key start
LH: loop header
LB: loop body
LE: loop exit
PB: predicated region body
PF: predicated region fallthrough
CT: control target
= control target key end

     0   :  { %s1637_s3 = inlined_call_operand.vmem [shape: f32[128,128], index: 3, kind: input, shape index: {}]   ;;  %s1638_s0 = inlined_call_operand.vmem [shape: f32[32,128], index: 0, kind: input, shape index: {}]   ;;  %s1639_s1 = inlined_call_operand.vmem [shape: f32[1,128], index: 1, kind: input, shape index: {}]   ;;  %s1640_s2 = inlined_call_operand.vmem [shape: f32[1,128], index: 2, kind: input, shape index: {}]   ;;  %s1641_s4 = inlined_call_operand.vmem [shape: f32[32,128], index: 4, kind: output, shape index: {}]  }
   0x1   :  { %v36_v0 = vld [vmem:[%s1637_s3 + $0x78] sm:$0xff]  ;;  %v35_v1 = vld [vmem:[%s1637_s3 + $0x70] sm:$0xff]  ;;  %v34_v2 = vld [vmem:[%s1637_s3 + $0x68] sm:$0xff] }
   0x2   :  { %v1037_v3 = vand.u32 4294901760, %v36_v0  ;;  %v1039_v4 = vand.u32 4294901760, %v35_v1  ;;  %v1041_v5 = vand.u32 4294901760, %v34_v2  ;;  %v33_v6 = vld [vmem:[%s1637_s3 + $0x60] sm:$0xff]  ;;  %v32_v7 = vld [vmem:[%s1637_s3 + $0x58] sm:$0xff]  ;;  %v31_v8 = vld [vmem:[%s1637_s3 + $0x50] sm:$0xff] }
   0x3   :  { %v1052_v9 = vand.u32 4294901760, %v33_v6  ;;  %v1054_v10 = vand.u32 4294901760, %v32_v7  ;;  %v1056_v11 = vand.u32 4294901760, %v31_v8  ;;  %v30_v12 = vld [vmem:[%s1637_s3 + $0x48] sm:$0xff]  ;;  %v29_v13 = vld [vmem:[%s1637_s3 + $0x40] sm:$0xff]  ;;  %v28_v18 = vld [vmem:[%s1637_s3 + $0x38] sm:$0xff] }
   0x4   :  { %38 = vmatpush.msra.mxu0 %v1037_v3  ;;  %v1066_v14 = vsub.f32 %v36_v0, %v1037_v3  ;;  %285 = vmatpush.msra.mxu3 %v1037_v3  ;;  %v1070_v15 = vsub.f32 %v35_v1, %v1039_v4  ;;  %v1073_v16 = vsub.f32 %v34_v2, %v1041_v5  ;;  %v1075_v17 = vand.u32 4294901760, %v30_v12  ;;  %v27_v29 = vld [vmem:[%s1637_s3 + $0x30] sm:$0xff]  ;;  %v26_v36 = vld [vmem:[%s1637_s3 + $0x28] sm:$0xff]  ;;  %v25_v43 = vld [vmem:[%s1637_s3 + $0x20] sm:$0xff] }
   0x5   :  { %v1081_v19 = vsub.f32 %v33_v6, %v1052_v9  ;;  %v1084_v20 = vsub.f32 %v32_v7, %v1054_v10  ;;  %v1086_v21 = vand.u32 4294901760, %v29_v13  ;;  %v1089_v22 = vsub.f32 %v31_v8, %v1056_v11  ;;  %v24_v49 = vld [vmem:[%s1637_s3 + $0x18] sm:$0xff]  ;;  %v23_v55 = vld [vmem:[%s1637_s3 + $0x10] sm:$0xff]  ;;  %v1195_v56 = vld [vmem:[%s1638_s0] sm:$0xff] }
   0x6   :  { %1656 = vst [vmem:[#allocation2_spill] sm:$0xff] %v1066_v14  ;;  %40 = vmatpush.msra.mxu0 %v1039_v4  ;;  %217 = vmatpush.msra.mxu2 %v1066_v14  ;;  %v1094_v23 = vand.u32 4294901760, %v1066_v14  ;;  %v1097_v24 = vand.u32 4294901760, %v1070_v15  ;;  %v1100_v25 = vand.u32 4294901760, %v1073_v16  ;;  %v1106_v27 = vand.u32 4294901760, %v28_v18  ;;  %v22_v62 = vld [vmem:[%s1637_s3 + $0x8] sm:$0xff] }
   0x7   :  { %1657 = vst [vmem:[#allocation3_spill] sm:$0xff] %v1070_v15  ;;  %287 = vmatpush.msra.mxu3 %v1039_v4  ;;  %v1104_v26 = vand.u32 4294901760, %v1081_v19  ;;  %v1109_v28 = vsub.f32 %v30_v12, %v1075_v17  ;;  %v1123_v33 = vand.u32 4294901760, %v1084_v20  ;;  %v1127_v34 = vand.u32 4294901760, %v1089_v22  ;;  %v21_v8 = vld [vmem:[%s1637_s3] sm:$0xff] }
   0x8   :  { %1658 = vst [vmem:[#allocation4_spill] sm:$0xff] %v1073_v16  ;;  %42 = vmatpush.msra.mxu0 %v1041_v5  ;;  %220 = vmatpush.msra.mxu2 %v1070_v15  ;;  %v105_v30 = vsub.f32 %v1066_v14, %v1094_v23  ;;  %v111_v31 = vsub.f32 %v1070_v15, %v1097_v24  ;;  %v1143_v40 = vand.u32 4294901760, %v27_v29  ;;  %v1161_v46 = vand.u32 4294901760, %v26_v36 }
   0x9   :  { %1659 = vst [vmem:[#allocation5_spill] sm:$0xff] %v1081_v19  ;;  %v117_v32 = vsub.f32 %v1073_v16, %v1100_v25  ;;  %289 = vmatpush.msra.mxu3 %v1041_v5  ;;  %v1130_v35 = vsub.f32 %v29_v13, %v1086_v21  ;;  %v123_v39 = vsub.f32 %v1081_v19, %v1104_v26  ;;  %v1147_v41 = vand.u32 4294901760, %v1109_v28 }
   0xa   :  { %1660 = vst [vmem:[#allocation6_spill] sm:$0xff] %v1084_v20  ;;  %44 = vmatpush.msra.mxu0 %v1052_v9  ;;  %v1136_v37 = vand.u32 4294901760, %v105_v30  ;;  %223 = vmatpush.msra.mxu2 %v1073_v16  ;;  %v1139_v38 = vand.u32 4294901760, %v111_v31  ;;  %v1150_v42 = vsub.f32 %v28_v18, %v1106_v27  ;;  %v129_v45 = vsub.f32 %v1084_v20, %v1123_v33  ;;  %v1258_v31 = vld [vmem:[%s1638_s0 + $0x8] sm:$0xff] }
   0xb   :  { %1661 = vst [vmem:[#allocation7_spill] sm:$0xff] %v1089_v22  ;;  %291 = vmatpush.msra.mxu3 %v1052_v9  ;;  %v1157_v44 = vand.u32 4294901760, %v117_v32  ;;  %v135_v47 = vsub.f32 %v1089_v22, %v1127_v34  ;;  %v1168_v48 = vand.u32 4294901760, %v1130_v35  ;;  %v1175_v50 = vand.u32 4294901760, %v123_v39 }
   0xc   :  { %1662 = vst [vmem:[#allocation8_spill] sm:$0xff] %v1109_v28  ;;  %46 = vmatpush.msra.mxu0 %v1054_v10  ;;  %107 = vmatpush.msra.mxu1 %v1136_v37  ;;  %v1177_v51 = vand.u32 4294901760, %v25_v43  ;;  %v1180_v52 = vsub.f32 %v27_v29, %v1143_v40  ;;  %v141_v53 = vsub.f32 %v1109_v28, %v1147_v41  ;;  %v1187_v54 = vand.u32 4294901760, %v1150_v42 }
   0xd   :  { %1663 = vst [vmem:[#allocation9_spill] sm:$0xff] %v1130_v35  ;;  %226 = vmatpush.msra.mxu2 %v1081_v19  ;;  %293 = vmatpush.msra.mxu3 %v1054_v10  ;;  %v1199_v57 = vand.u32 4294901760, %v129_v45  ;;  %v1201_v58 = vand.u32 4294901760, %v24_v49  ;;  %v1204_v59 = vsub.f32 %v26_v36, %v1161_v46  ;;  %v1208_v60 = vand.u32 4294901760, %v135_v47 }
   0xe   :  { %1664 = vst [vmem:[#allocation10_spill] sm:$0xff] %v1150_v42  ;;  %48 = vmatpush.msra.mxu0 %v1056_v11  ;;  %113 = vmatpush.msra.mxu1 %v1139_v38  ;;  %v147_v61 = vsub.f32 %v1130_v35, %v1168_v48  ;;  %v1217_v63 = vand.u32 4294901760, %v23_v55  ;;  %v1220_v0 = vand.u32 4294901760, %v1180_v52  ;;  %v1223_v1 = vsub.f32 %v25_v43, %v1177_v51 }
   0xf   :  { %1665 = vst [vmem:[#allocation11_spill] sm:$0xff] %v1180_v52  ;;  %229 = vmatpush.msra.mxu2 %v1084_v20  ;;  %295 = vmatpush.msra.mxu3 %v1056_v11  ;;  %v1226_v2 = vand.u32 4294901760, %v1195_v56  ;;  %v1230_v6 = vand.u32 4294901760, %v141_v53  ;;  %v153_v7 = vsub.f32 %v1150_v42, %v1187_v54  ;;  %v1239_v12 = vand.u32 4294901760, %v22_v62 }
  0x10   :  { %50 = vmatpush.msra.mxu0 %v1075_v17  ;;  %119 = vmatpush.msra.mxu1 %v1157_v44  ;;  %1666 = vst [vmem:[#allocation12_spill] sm:$0xff] %v1204_v59  ;;  %v1242_v13 = vand.u32 4294901760, %v1204_v59  ;;  %v1245_v18 = vsub.f32 %v24_v49, %v1201_v58  ;;  %v1253_v30 = vand.u32 4294901760, %v147_v61  ;;  %v159_v32 = vsub.f32 %v1180_v52, %v1220_v0 }
  0x11   :  { %232 = vmatpush.msra.mxu2 %v1089_v22  ;;  %297 = vmatpush.msra.mxu3 %v1075_v17  ;;  %1667 = vst [vmem:[#allocation13_spill] sm:$0xff] %v1223_v1  ;;  %v1249_v29 = vsub.f32 %v1195_v56, %v1226_v2  ;;  %v1264_v36 = vand.u32 4294901760, %v21_v8  ;;  %v1267_v39 = vand.u32 4294901760, %v1223_v1  ;;  %v1270_v43 = vsub.f32 %v23_v55, %v1217_v63 }
  0x12   :  { %52 = vmatpush.msra.mxu0 %v1086_v21  ;;  %125 = vmatpush.msra.mxu1 %v1175_v50  ;;  %1668 = vst [vmem:[#allocation14_spill] sm:$0xff] %v1245_v18  ;;  %v1274_v45 = vand.u32 4294901760, %v153_v7  ;;  %v165_v49 = vsub.f32 %v1204_v59, %v1242_v13  ;;  %v1282_v53 = vand.u32 4294901760, %v1245_v18  ;;  %v1285_v55 = vsub.f32 %v22_v62, %v1239_v12 }
  0x13   :  { %235 = vmatpush.msra.mxu2 %v1109_v28  ;;  %299 = vmatpush.msra.mxu3 %v1086_v21  ;;  %1669 = vst [vmem:[#allocation15_spill] sm:$0xff] %v1270_v43  ;;  %v71_v47 = vand.u32 4294901760, %v1249_v29  ;;  %v1288_v61 = vand.u32 4294901760, %v1258_v31  ;;  %v1294_v7 = vand.u32 4294901760, %v159_v32  ;;  %v1302_v62 = vsub.f32 %v21_v8, %v1264_v36 }
  0x14   :  { %54 = vmatpush.msra.mxu0 %v1106_v27  ;;  %131 = vmatpush.msra.mxu1 %v1199_v57  ;;  %v1309_v32 = vand.u32 4294901760, %v165_v49  ;;  %v177_v28 = vsub.f32 %v1245_v18, %v1282_v53  ;;  %v1314_v22 = vand.u32 4294901760, %v1285_v55 }
  0x15   :  { %238 = vmatpush.msra.mxu2 %v1130_v35  ;;  %301 = vmatpush.msra.mxu3 %v1106_v27  ;;  %v1299_v35 = vand.u32 4294901760, %v1270_v43  ;;  %v1318_v8 = vsub.f32 %v1258_v31, %v1288_v61  ;;  %v1329_v20 = vand.u32 4294901760, %v1302_v62 }
  0x16   :  { %56 = vmatpush.msra.mxu0 %v1143_v40  ;;  %137 = vmatpush.msra.mxu1 %v1208_v60  ;;  %v189_v16 = vsub.f32 %v1285_v55, %v1314_v22 }
  0x17   :  { %241 = vmatpush.msra.mxu2 %v1150_v42  ;;  %303 = vmatpush.msra.mxu3 %v1143_v40  ;;  %v171_v42 = vsub.f32 %v1223_v1, %v1267_v39  ;;  %v79_v15 = vand.u32 4294901760, %v1318_v8 }
  0x18   :  { %58 = vmatpush.msra.mxu0 %v1161_v46  ;;  %143 = vmatpush.msra.mxu1 %v1230_v6 }
  0x19   :  { %244 = vmatpush.msra.mxu2 %v1180_v52  ;;  %305 = vmatpush.msra.mxu3 %v1161_v46  ;;  %v72_v52 = vsub.f32 %v1249_v29, %v71_v47  ;;  %v1324_v49 = vand.u32 4294901760, %v171_v42  ;;  %v1340_v42 = vand.u32 4294901760, %v177_v28  ;;  %v80_v14 = vsub.f32 %v1318_v8, %v79_v15 }
  0x1a   :  { %60 = vmatpush.msra.mxu0 %v1177_v51  ;;  %149 = vmatpush.msra.mxu1 %v1253_v30 }
  0x1b   :  { %247 = vmatpush.msra.mxu2 %v1204_v59  ;;  %307 = vmatpush.msra.mxu3 %v1177_v51  ;;  %v183_v59 = vsub.f32 %v1270_v43, %v1299_v35  ;;  %v73_v19 = vand.u32 4294901760, %v72_v52 }
  0x1c   :  { %62 = vmatpush.msra.mxu0 %v1201_v58  ;;  %155 = vmatpush.msra.mxu1 %v1274_v45 }
  0x1d   :  { %250 = vmatpush.msra.mxu2 %v1223_v1  ;;  %309 = vmatpush.msra.mxu3 %v1201_v58  ;;  %v1336_v1 = vld [vmem:[%s1638_s0 + $0x10] sm:$0xff]  ;;  %v1349_v52 = vand.u32 4294901760, %v183_v59 }
  0x1e   :  { %64 = vmatpush.msra.mxu0 %v1217_v63  ;;  %161 = vmatpush.msra.mxu1 %v1294_v7  ;;  %v1354_v28 = vand.u32 4294901760, %v1336_v1 }
  0x1f   :  { %253 = vmatpush.msra.mxu2 %v1245_v18  ;;  %311 = vmatpush.msra.mxu3 %v1217_v63  ;;  %v195_v18 = vsub.f32 %v1302_v62, %v1329_v20 }
  0x20   :  { %66 = vmatpush.msra.mxu0 %v1239_v12  ;;  %167 = vmatpush.msra.mxu1 %v1309_v32 }
  0x21   :  { %256 = vmatpush.msra.mxu2 %v1270_v43  ;;  %313 = vmatpush.msra.mxu3 %v1239_v12  ;;  %v1359_v43 = vand.u32 4294901760, %v189_v16  ;;  %v1366_v59 = vand.u32 4294901760, %v195_v18  ;;  %v81_v16 = vand.u32 4294901760, %v80_v14  ;;  %v1378_v18 = vld [vmem:[%s1638_s0 + $0x18] sm:$0xff] }
  0x22   :  { %68 = vmatpush.msra.mxu0 %v1264_v36  ;;  %173 = vmatpush.msra.mxu1 %v1324_v49  ;;  %v1386_v14 = vand.u32 4294901760, %v1378_v18 }
  0x23   :  { %74 = vmatmul.f32.vlgmr.msra.gmra.mxu0 %v73_v19  ;;  %259 = vmatpush.msra.mxu2 %v1285_v55  ;;  %v86_v19 = vsub.f32 %v1336_v1, %v1354_v28 }
  0x24   :  { %179 = vmatpush.msra.mxu1 %v1340_v42  ;;  %344 = vmatpush.msrb.mxu0 %v1094_v23 }
  0x25   :  { %262 = vmatpush.msra.mxu2 %v1302_v62  ;;  %315 = vmatpush.msra.mxu3 %v1264_v36 }
  0x26   :  { %185 = vmatpush.msra.mxu1 %v1349_v52  ;;  %348 = vmatpush.msrb.mxu0 %v1097_v24 }
  0x27   :  { %265 = vmatmul.f32.vlgmr.msra.gmra.mxu2 %v1249_v29  ;;  %319 = vmatmul.f32.vlgmr.msra.gmra.mxu3 %v71_v47  ;;  %v87_v29 = vand.u32 4294901760, %v86_v19 }
  0x28   :  { %476 = vmatpush.msrb.mxu2 %v1037_v3  ;;  %191 = vmatpush.msra.mxu1 %v1359_v43 }
  0x29   :  { %352 = vmatpush.msrb.mxu0 %v1100_v25  ;;  %545 = vmatpush.msrb.mxu3 %v1136_v37  ;;  %v88_v37 = vsub.f32 %v86_v19, %v87_v29 }
  0x2a   :  { %478 = vmatpush.msrb.mxu2 %v1039_v4  ;;  %197 = vmatpush.msra.mxu1 %v1366_v59 }
  0x2b   :  { %356 = vmatpush.msrb.mxu0 %v1104_v26  ;;  %551 = vmatpush.msrb.mxu3 %v1139_v38  ;;  %v94_v38 = vsub.f32 %v1378_v18, %v1386_v14 }
  0x2c   :  { %82 = vmatmul.f32.gmra.mxu0 %v81_v16  ;;  %199 = vmatmul.f32.vlgmr.msra.gmra.mxu1 %v1226_v2 }
  0x2d   :  { %423 = vmatpush.msrb.mxu1 %v1037_v3  ;;  %480 = vmatpush.msrb.mxu2 %v1041_v5 }
  0x2e   :  { %360 = vmatpush.msrb.mxu0 %v1123_v33  ;;  %557 = vmatpush.msrb.mxu3 %v1157_v44  ;;  %v89_v44 = vand.u32 4294901760, %v88_v37  ;;  %v1672_v37 = vld [vmem:[#allocation4_spill] sm:$0xff] }
  0x2f   :  { %425 = vmatpush.msrb.mxu1 %v1039_v4  ;;  %482 = vmatpush.msrb.mxu2 %v1052_v9 }
  0x30   :  { %364 = vmatpush.msrb.mxu0 %v1127_v34  ;;  %563 = vmatpush.msrb.mxu3 %v1175_v50  ;;  %v95_v50 = vand.u32 4294901760, %v94_v38 }
  0x31   :  { %270 = vmatmul.f32.gmra.mxu2 %v1318_v8  ;;  %325 = vmatmul.f32.gmra.mxu3 %v79_v15  ;;  %v471_v15 = vmul.f32 %v1195_v56, %v1195_v56 }
  0x32   :  { %427 = vmatpush.msrb.mxu1 %v1041_v5  ;;  %484 = vmatpush.msrb.mxu2 %v1054_v10 }
  0x33   :  { %368 = vmatpush.msrb.mxu0 %v1147_v41  ;;  %569 = vmatpush.msrb.mxu3 %v1199_v57  ;;  %v96_v57 = vsub.f32 %v94_v38, %v95_v50 }
  0x34   :  { %429 = vmatpush.msrb.mxu1 %v1052_v9  ;;  %486 = vmatpush.msrb.mxu2 %v1056_v11 }
  0x35   :  { %372 = vmatpush.msrb.mxu0 %v1168_v48  ;;  %575 = vmatpush.msrb.mxu3 %v1208_v60  ;;  %v1418_v60 = vand.u32 4294901760, %v471_v15  ;;  %v97_v47 = vand.u32 4294901760, %v96_v57 }
  0x36   :  { %90 = vmatmul.f32.gmra.mxu0 %v89_v44  ;;  %203 = vmatmul.f32.gmra.mxu1 %v1288_v61  ;;  %v474_v44 = vmul.f32 %v1378_v18, %v1378_v18 }
  0x37   :  { %431 = vmatpush.msrb.mxu1 %v1054_v10  ;;  %488 = vmatpush.msrb.mxu2 %v1075_v17 }
  0x38   :  { %376 = vmatpush.msrb.mxu0 %v1187_v54  ;;  %581 = vmatpush.msrb.mxu3 %v1230_v6  ;;  %v1429_v6 = vsub.f32 %v471_v15, %v1418_v60 }
  0x39   :  { %433 = vmatpush.msrb.mxu1 %v1056_v11  ;;  %490 = vmatpush.msrb.mxu2 %v1086_v21 }
  0x3a   :  { %380 = vmatpush.msrb.mxu0 %v1220_v0  ;;  %587 = vmatpush.msrb.mxu3 %v1253_v30  ;;  %v472_v30 = vmul.f32 %v1258_v31, %v1258_v31 }
  0x3b   :  { %275 = vmatmul.f32.gmra.mxu2 %v86_v19  ;;  %331 = vmatmul.f32.gmra.mxu3 %v87_v29  ;;  %v1670_v19 = vld [vmem:[#allocation2_spill] sm:$0xff] }
  0x3c   :  { %435 = vmatpush.msrb.mxu1 %v1075_v17  ;;  %492 = vmatpush.msrb.mxu2 %v1106_v27 }
  0x3d   :  { %384 = vmatpush.msrb.mxu0 %v1242_v13  ;;  %593 = vmatpush.msrb.mxu3 %v1274_v45  ;;  %v509_v45 = vand.u32 4294901760, %v1429_v6 }
  0x3e   :  { %437 = vmatpush.msrb.mxu1 %v1086_v21  ;;  %494 = vmatpush.msrb.mxu2 %v1143_v40 }
  0x3f   :  { %388 = vmatpush.msrb.mxu0 %v1267_v39  ;;  %599 = vmatpush.msrb.mxu3 %v1294_v7  ;;  %v1443_v7 = vand.u32 4294901760, %v472_v30 }
  0x40   :  { %98 = vmatmul.f32.gmra.mxu0 %v97_v47  ;;  %207 = vmatmul.f32.gmra.mxu1 %v1354_v28 }
  0x41   :  { %439 = vmatpush.msrb.mxu1 %v1106_v27  ;;  %496 = vmatpush.msrb.mxu2 %v1161_v46  ;;  %v1455_v8 = vsub.f32 %v472_v30, %v1443_v7 }
  0x42   :  { %392 = vmatpush.msrb.mxu0 %v1282_v53  ;;  %605 = vmatpush.msrb.mxu3 %v1309_v32  ;;  %v510_v32 = vsub.f32 %v1429_v6, %v509_v45 }
  0x43   :  { %441 = vmatpush.msrb.mxu1 %v1143_v40  ;;  %498 = vmatpush.msrb.mxu2 %v1177_v51  ;;  %v517_v16 = vand.u32 4294901760, %v1455_v8 }
  0x44   :  { %396 = vmatpush.msrb.mxu0 %v1299_v35  ;;  %611 = vmatpush.msrb.mxu3 %v1324_v49  ;;  %v473_v49 = vmul.f32 %v1336_v1, %v1336_v1 }
  0x45   :  { %280 = vmatmul.f32.gmra.mxu2 %v94_v38  ;;  %337 = vmatmul.f32.gmra.mxu3 %v95_v50  ;;  %v1673_v38 = vld [vmem:[#allocation5_spill] sm:$0xff] }
  0x46   :  { %443 = vmatpush.msrb.mxu1 %v1161_v46  ;;  %500 = vmatpush.msrb.mxu2 %v1201_v58  ;;  %v1472_v29 = vand.u32 4294901760, %v473_v49 }
  0x47   :  { %400 = vmatpush.msrb.mxu0 %v1314_v22  ;;  %617 = vmatpush.msrb.mxu3 %v1340_v42  ;;  %v511_v42 = vand.u32 4294901760, %v510_v32 }
  0x48   :  { %445 = vmatpush.msrb.mxu1 %v1177_v51  ;;  %502 = vmatpush.msrb.mxu2 %v1217_v63 }
  0x49   :  { %404 = vmatpush.msrb.mxu0 %v1329_v20  ;;  %623 = vmatpush.msrb.mxu3 %v1349_v52  ;;  %v1671_v52 = vld [vmem:[#allocation3_spill] sm:$0xff] }
  0x4a   :  { %211 = vmatmul.f32.gmra.mxu1 %v1386_v14  ;;  %406 = vmatmul.f32.vlgmr.msrb.gmra.mxu0 %v1226_v2 }
  0x4b   :  { %447 = vmatpush.msrb.mxu1 %v1201_v58  ;;  %504 = vmatpush.msrb.mxu2 %v1239_v12 }
  0x4c   :  { %629 = vmatpush.msrb.mxu3 %v1359_v43  ;;  %655 = vmatpush.msra.mxu0 %v1670_v19  ;;  %v518_v43 = vsub.f32 %v1455_v8, %v517_v16 }
  0x4d   :  { %449 = vmatpush.msrb.mxu1 %v1217_v63  ;;  %506 = vmatpush.msrb.mxu2 %v1264_v36 }
  0x4e   :  { %635 = vmatpush.msrb.mxu3 %v1366_v59  ;;  %658 = vmatpush.msra.mxu0 %v1671_v52  ;;  %v1485_v59 = vsub.f32 %v473_v49, %v1472_v29 }
  0x4f   :  { %451 = vmatpush.msrb.mxu1 %v1239_v12  ;;  %512 = vmatmul.f32.vlgmr.msrb.gmra.mxu2 %v511_v42 }
  0x50   :  { %637 = vmatmul.f32.vlgmr.msrb.gmra.mxu3 %v1418_v60  ;;  %782 = vmatpush.msra.mxu2 %v1094_v23  ;;  %v519_v23 = vand.u32 4294901760, %v518_v43  ;;  %v525_v50 = vand.u32 4294901760, %v1485_v59 }
  0x51   :  { %661 = vmatpush.msra.mxu0 %v1672_v37  ;;  %453 = vmatpush.msrb.mxu1 %v1264_v36 }
  0x52   :  { %786 = vmatpush.msra.mxu2 %v1097_v24  ;;  %861 = vmatpush.msra.mxu3 %v1037_v3  ;;  %v1674_v24 = vld [vmem:[#allocation6_spill] sm:$0xff] }
  0x53   :  { %664 = vmatpush.msra.mxu0 %v1673_v38  ;;  %455 = vmatmul.f32.vlgmr.msrb.gmra.mxu1 %v1226_v2  ;;  %v1675_v2 = vld [vmem:[#allocation7_spill] sm:$0xff] }
  0x54   :  { %410 = vmatmul.f32.gmra.mxu0 %v1288_v61  ;;  %723 = vmatpush.msra.mxu1 %v1037_v3  ;;  %v1501_v3 = vand.u32 4294901760, %v474_v44 }
  0x55   :  { %790 = vmatpush.msra.mxu2 %v1100_v25  ;;  %863 = vmatpush.msra.mxu3 %v1039_v4  ;;  %v1676_v25 = vld [vmem:[#allocation8_spill] sm:$0xff] }
  0x56   :  { %667 = vmatpush.msra.mxu0 %v1674_v24  ;;  %725 = vmatpush.msra.mxu1 %v1039_v4  ;;  %v526_v4 = vsub.f32 %v1485_v59, %v525_v50 }
  0x57   :  { %794 = vmatpush.msra.mxu2 %v1104_v26  ;;  %865 = vmatpush.msra.mxu3 %v1041_v5  ;;  %v1515_v26 = vsub.f32 %v474_v44, %v1501_v3 }
  0x58   :  { %670 = vmatpush.msra.mxu0 %v1675_v2  ;;  %520 = vmatmul.f32.gmra.mxu2 %v519_v23 }
  0x59   :  { %641 = vmatmul.f32.gmra.mxu3 %v1443_v7  ;;  %727 = vmatpush.msra.mxu1 %v1041_v5  ;;  %v1677_v5 = vld [vmem:[#allocation9_spill] sm:$0xff] }
  0x5a   :  { %798 = vmatpush.msra.mxu2 %v1123_v33  ;;  %867 = vmatpush.msra.mxu3 %v1052_v9  ;;  %v527_v33 = vand.u32 4294901760, %v526_v4 }
  0x5b   :  { %673 = vmatpush.msra.mxu0 %v1676_v25  ;;  %729 = vmatpush.msra.mxu1 %v1052_v9  ;;  %v1678_v9 = vld [vmem:[#allocation10_spill] sm:$0xff] }
  0x5c   :  { %802 = vmatpush.msra.mxu2 %v1127_v34  ;;  %869 = vmatpush.msra.mxu3 %v1054_v10  ;;  %v533_v34 = vand.u32 4294901760, %v1515_v26 }
  0x5d   :  { %676 = vmatpush.msra.mxu0 %v1677_v5  ;;  %459 = vmatmul.f32.gmra.mxu1 %v1288_v61  ;;  %v1679_v61 = vld [vmem:[#allocation11_spill] sm:$0xff] }
  0x5e   :  { %414 = vmatmul.f32.gmra.mxu0 %v1354_v28  ;;  %731 = vmatpush.msra.mxu1 %v1054_v10  ;;  %v534_v10 = vsub.f32 %v1515_v26, %v533_v34 }
  0x5f   :  { %806 = vmatpush.msra.mxu2 %v1147_v41  ;;  %871 = vmatpush.msra.mxu3 %v1056_v11  ;;  %v1681_v41 = vld [vmem:[#allocation13_spill] sm:$0xff] }
  0x60   :  { %679 = vmatpush.msra.mxu0 %v1678_v9  ;;  %733 = vmatpush.msra.mxu1 %v1056_v11  ;;  %v1680_v11 = vld [vmem:[#allocation12_spill] sm:$0xff] }
  0x61   :  { %810 = vmatpush.msra.mxu2 %v1168_v48  ;;  %873 = vmatpush.msra.mxu3 %v1075_v17  ;;  %v1682_v48 = vld [vmem:[#allocation14_spill] sm:$0xff] }
  0x62   :  { %682 = vmatpush.msra.mxu0 %v1679_v61  ;;  %528 = vmatmul.f32.gmra.mxu2 %v527_v33 }
  0x63   :  { %645 = vmatmul.f32.gmra.mxu3 %v1472_v29  ;;  %735 = vmatpush.msra.mxu1 %v1075_v17  ;;  %v535_v17 = vand.u32 4294901760, %v534_v10 }
  0x64   :  { %814 = vmatpush.msra.mxu2 %v1187_v54  ;;  %875 = vmatpush.msra.mxu3 %v1086_v21 }
  0x65   :  { %685 = vmatpush.msra.mxu0 %v1680_v11  ;;  %737 = vmatpush.msra.mxu1 %v1086_v21  ;;  %v1683_v21 = vld [vmem:[#allocation15_spill] sm:$0xff] }
  0x66   :  { %818 = vmatpush.msra.mxu2 %v1220_v0  ;;  %877 = vmatpush.msra.mxu3 %v1106_v27 }
  0x67   :  { %688 = vmatpush.msra.mxu0 %v1681_v41  ;;  %463 = vmatmul.f32.gmra.mxu1 %v1354_v28 }
  0x68   :  { %418 = vmatmul.f32.gmra.mxu0 %v1386_v14  ;;  %739 = vmatpush.msra.mxu1 %v1106_v27 }
  0x69   :  { %822 = vmatpush.msra.mxu2 %v1242_v13  ;;  %879 = vmatpush.msra.mxu3 %v1143_v40 }
  0x6a   :  { %691 = vmatpush.msra.mxu0 %v1682_v48  ;;  %741 = vmatpush.msra.mxu1 %v1143_v40 }
  0x6b   :  { %826 = vmatpush.msra.mxu2 %v1267_v39  ;;  %881 = vmatpush.msra.mxu3 %v1161_v46 }
  0x6c   :  { %694 = vmatpush.msra.mxu0 %v1683_v21  ;;  %536 = vmatmul.f32.gmra.mxu2 %v535_v17 }
  0x6d   :  { %649 = vmatmul.f32.gmra.mxu3 %v1501_v3  ;;  %743 = vmatpush.msra.mxu1 %v1161_v46 }
  0x6e   :  { %830 = vmatpush.msra.mxu2 %v1282_v53  ;;  %883 = vmatpush.msra.mxu3 %v1177_v51 }
  0x6f   :  { %697 = vmatpush.msra.mxu0 %v1285_v55  ;;  %745 = vmatpush.msra.mxu1 %v1177_v51 }
  0x70   :  { %834 = vmatpush.msra.mxu2 %v1299_v35  ;;  %885 = vmatpush.msra.mxu3 %v1201_v58 }
  0x71   :  { %700 = vmatpush.msra.mxu0 %v1302_v62  ;;  %467 = vmatmul.f32.gmra.mxu1 %v1386_v14 }
  0x72   :  { %703 = vmatmul.f32.vlgmr.msra.gmra.mxu0 %v1429_v6  ;;  %747 = vmatpush.msra.mxu1 %v1201_v58 }
  0x73   :  { %838 = vmatpush.msra.mxu2 %v1314_v22  ;;  %887 = vmatpush.msra.mxu3 %v1217_v63 }
  0x74   :  { %749 = vmatpush.msra.mxu1 %v1217_v63 }
  0x75   :  { %842 = vmatpush.msra.mxu2 %v1329_v20  ;;  %889 = vmatpush.msra.mxu3 %v1239_v12 }
  0x76   :  { %751 = vmatpush.msra.mxu1 %v1239_v12  ;;  %844 = vmatmul.f32.vlgmr.msra.gmra.mxu2 %v1418_v60 }
  0x77   :  { %891 = vmatpush.msra.mxu3 %v1264_v36 }
  0x78   :  { %753 = vmatpush.msra.mxu1 %v1264_v36  ;;  %893 = vmatmul.f32.vlgmr.msra.gmra.mxu3 %v1418_v60 }
  0x79   :  { %757 = vmatmul.f32.vlgmr.msra.gmra.mxu1 %v509_v45 }
  0x7a   :  { %708 = vmatmul.f32.gmra.mxu0 %v1455_v8 }
  0x7e   :  { %848 = vmatmul.f32.gmra.mxu2 %v1443_v7 }
  0x80   :  { %897 = vmatmul.f32.gmra.mxu3 %v1443_v7 }
  0x81   :  { %763 = vmatmul.f32.gmra.mxu1 %v517_v16 }
  0x82   :  { %713 = vmatmul.f32.gmra.mxu0 %v1485_v59 }
  0x86   :  { %852 = vmatmul.f32.gmra.mxu2 %v1472_v29 }
  0x88   :  { %901 = vmatmul.f32.gmra.mxu3 %v1472_v29 }
  0x89   :  { %769 = vmatmul.f32.gmra.mxu1 %v525_v50 }
  0x8a   :  { %718 = vmatmul.f32.gmra.mxu0 %v1515_v26 }
  0x8e   :  { %856 = vmatmul.f32.gmra.mxu2 %v1501_v3 }
  0x90   :  { %905 = vmatmul.f32.gmra.mxu3 %v1501_v3 }
  0x91   :  { %775 = vmatmul.f32.gmra.mxu1 %v533_v34 }
  0xa0   :  { %v75_v20 = vpop.f32.mrf.mxu0 }
  0xa9   :  { %v83_v22 = vpop.f32.mrf.mxu0  ;;  %v200_v27 = vpop.f32.mrf.mxu1 }
  0xaa   :  { %v266_v35 = vpop.f32.mrf.mxu2  ;;  %v320_v40 = vpop.f32.mrf.mxu3  ;;  %v201_v8 = vadd.f32 %v200_v27, %v75_v20 }
  0xac   :  { %v267_v16 = vadd.f32 %v266_v35, %v201_v8 }
  0xae   :  { %v321_v43 = vadd.f32 %v320_v40, %v267_v16 }
  0xb3   :  { %v91_v46 = vpop.f32.mrf.mxu0  ;;  %v204_v51 = vpop.f32.mrf.mxu1 }
  0xb4   :  { %v271_v54 = vpop.f32.mrf.mxu2  ;;  %v326_v58 = vpop.f32.mrf.mxu3  ;;  %v205_v37 = vadd.f32 %v204_v51, %v83_v22 }
  0xb6   :  { %v272_v50 = vadd.f32 %v271_v54, %v205_v37 }
  0xb8   :  { %v327_v5 = vadd.f32 %v326_v58, %v272_v50 }
  0xbd   :  { %v99_v63 = vpop.f32.mrf.mxu0  ;;  %v208_v0 = vpop.f32.mrf.mxu1 }
  0xbe   :  { %v276_v12 = vpop.f32.mrf.mxu2  ;;  %v332_v13 = vpop.f32.mrf.mxu3  ;;  %v209_v33 = vadd.f32 %v208_v0, %v91_v46 }
  0xc0   :  { %v277_v48 = vadd.f32 %v276_v12, %v209_v33 }
  0xc2   :  { %v333_v46 = vadd.f32 %v332_v13, %v277_v48 }
  0xc7   :  { %v212_v36 = vpop.f32.mrf.mxu1  ;;  %v407_v39 = vpop.f32.mrf.mxu0 }
  0xc8   :  { %v281_v53 = vpop.f32.mrf.mxu2  ;;  %v1586_v55 = vpop.f32.mrf.mxu3  ;;  %v408_v38 = vadd.f32 %v407_v39, %v321_v43  ;;  %v213_v54 = vadd.f32 %v212_v36, %v99_v63 }
  0xd0   :  { %v456_v62 = vpop.f32.mrf.mxu1 }
  0xd1   :  { %v411_v28 = vpop.f32.mrf.mxu0  ;;  %v1592_v2 = vadd.f32 %v456_v62, %v408_v38 }
  0xd2   :  { %v513_v14 = vpop.f32.mrf.mxu2  ;;  %v412_v10 = vadd.f32 %v411_v28, %v327_v5 }
  0xd3   :  { %v638_v15 = vpop.f32.mrf.mxu3  ;;  %v909_v9 = vmul.f32 %v1592_v2, %v1592_v2 }
  0xd4   :  { %v639_v52 = vadd.f32 %v638_v15, %v513_v14 }
  0xda   :  { %v460_v57 = vpop.f32.mrf.mxu1 }
  0xdb   :  { %v415_v60 = vpop.f32.mrf.mxu0  ;;  %v521_v47 = vpop.f32.mrf.mxu2  ;;  %v1596_v21 = vadd.f32 %v460_v57, %v412_v10  ;;  %v282_v57 = vadd.f32 %v281_v53, %v213_v54 }
  0xdc   :  { %v642_v6 = vpop.f32.mrf.mxu3  ;;  %v416_v62 = vadd.f32 %v415_v60, %v333_v46 }
  0xdd   :  { %v643_v25 = vadd.f32 %v642_v6, %v521_v47  ;;  %v910_v58 = vmul.f32 %v1596_v21, %v1596_v21  ;;  %v339_v16 = vadd.f32 %v1586_v55, %v282_v57 }
  0xe4   :  { %v464_v30 = vpop.f32.mrf.mxu1 }
  0xe5   :  { %v1588_v45 = vpop.f32.mrf.mxu0  ;;  %v529_v7 = vpop.f32.mrf.mxu2  ;;  %v1600_v47 = vadd.f32 %v464_v30, %v416_v62 }
  0xe6   :  { %v646_v32 = vpop.f32.mrf.mxu3  ;;  %v420_v53 = vadd.f32 %v1588_v45, %v339_v16  ;;  %v993_v45 = vld [vmem:[%s1639_s1] ss:$0 sm:$0xff] }
  0xe7   :  { %v647_v40 = vadd.f32 %v646_v32, %v529_v7  ;;  %v911_v60 = vmul.f32 %v1600_v47, %v1600_v47 }
  0xee   :  { %v1590_v49 = vpop.f32.mrf.mxu1 }
  0xef   :  { %v704_v42 = vpop.f32.mrf.mxu0  ;;  %v537_v19 = vpop.f32.mrf.mxu2 }
  0xf0   :  { %v650_v29 = vpop.f32.mrf.mxu3  ;;  %v705_v59 = vadd.f32 %v704_v42, %v639_v52 }
  0xf1   :  { %v651_v63 = vadd.f32 %v650_v29, %v537_v19  ;;  %v1607_v19 = vadd.f32 %v1590_v49, %v420_v53 }
  0xf3   :  { %v912_v49 = vmul.f32 %v1607_v19, %v1607_v19 }
  0xf6   :  { %v758_v23 = vpop.f32.mrf.mxu1 }
  0xf7   :  { %v709_v44 = vpop.f32.mrf.mxu0  ;;  %v759_v24 = vadd.f32 %v758_v23, %v705_v59 }
  0xf8   :  { %v710_v61 = vadd.f32 %v709_v44, %v643_v25 }
  0xf9   :  { %v845_v3 = vpop.f32.mrf.mxu2 }
  0xfa   :  { %v846_v4 = vadd.f32 %v845_v3, %v759_v24  ;;  %v961_v3 = vsub.f32 %v1195_v56, %v1592_v2 }
  0xfb   :  { %v894_v26 = vpop.f32.mrf.mxu3 }
  0xfc   :  { %v895_v34 = vadd.f32 %v894_v26, %v846_v4 }
  0xfe   :  { %v913_v11 = vsub.f32 %v895_v34, %v909_v9  ;;  %v764_v41 = vpop.f32.mrf.mxu1  ;;  %v994_v9 = vld [vmem:[%s1640_s2] ss:$0 sm:$0xff] }
  0xff   :  { %v765_v17 = vadd.f32 %v764_v41, %v710_v61  ;;  %v714_v22 = vpop.f32.mrf.mxu0 }
 0x100   :  { %v917_v20 = vadd.f32 1e-05, %v913_v11  ;;  %v715_v39 = vadd.f32 %v714_v22, %v647_v40  ;;  %v962_v22 = vsub.f32 %v1258_v31, %v1596_v21  ;;  %v963_v31 = vsub.f32 %v1336_v1, %v1600_v47 }
 0x101   :  { %v849_v27 = vpop.f32.mrf.mxu2 }
 0x102   :  { %995 = vrsqrt.f32 %v917_v20  ;;  %v850_v35 = vadd.f32 %v849_v27, %v765_v17  ;;  %vm927_vm1 = vweird.f32 %v917_v20 }
 0x103   :  { %v898_v51 = vpop.f32.mrf.mxu3 }
 0x104   :  { %v899_v0 = vadd.f32 %v898_v51, %v850_v35 }
 0x106   :  { %v914_v28 = vsub.f32 %v899_v0, %v910_v58  ;;  %v770_v14 = vpop.f32.mrf.mxu1 }
 0x107   :  { %v771_v12 = vadd.f32 %v770_v14, %v715_v39  ;;  %v719_v7 = vpop.f32.mrf.mxu0 }
 0x108   :  { %v996_v15 = vpop.eup %995  ;;  %v918_v6 = vadd.f32 1e-05, %v914_v28  ;;  %v720_v37 = vadd.f32 %v719_v7, %v651_v63 }
 0x109   :  { %v922_v8 = vmul.f32 %v996_v15, %v917_v20  ;;  %v853_v42 = vpop.f32.mrf.mxu2  ;;  %vm928_vm0 = vweird.f32 %v996_v15 }
 0x10a   :  { %997 = vrsqrt.f32 %v918_v6  ;;  %v854_v13 = vadd.f32 %v853_v42, %v771_v12  ;;  %vm929_vm2 = vmor %vm927_vm1, %vm928_vm0  ;;  %vm937_vm4 = vweird.f32 %v918_v6  ;;  %v964_v42 = vsub.f32 %v1378_v18, %v1607_v19 }
 0x10b   :  { %v923_v36 = vmul.f32 %v996_v15, %v922_v8  ;;  %v902_v32 = vpop.f32.mrf.mxu3 }
 0x10c   :  { %v903_v52 = vadd.f32 %v902_v32, %v854_v13 }
 0x10d   :  { %v924_v43 = vmul.f32 0.5, %v923_v36 }
 0x10e   :  { %v915_v30 = vsub.f32 %v903_v52, %v911_v60  ;;  %v776_v59 = vpop.f32.mrf.mxu1 }
 0x10f   :  { %v925_v38 = vsub.f32 1.5, %v924_v43  ;;  %v777_v23 = vadd.f32 %v776_v59, %v720_v37 }
 0x110   :  { %v998_v44 = vpop.eup %997  ;;  %v919_v29 = vadd.f32 1e-05, %v915_v30 }
 0x111   :  { %v926_v24 = vmul.f32 %v996_v15, %v925_v38  ;;  %v932_v55 = vmul.f32 %v998_v44, %v918_v6  ;;  %v857_v50 = vpop.f32.mrf.mxu2  ;;  %vm938_vm3 = vweird.f32 %v998_v44 }
 0x112   :  { %999 = vrsqrt.f32 %v919_v29  ;;  %v858_v4 = vadd.f32 %v857_v50, %v777_v23  ;;  %vm939_vm5 = vmor %vm937_vm4, %vm938_vm3  ;;  %vm947_vm7 = vweird.f32 %v919_v29 }
 0x113   :  { %v930_v25 = vsel %vm929_vm2, %v996_v15, %v926_v24  ;;  %v933_v26 = vmul.f32 %v998_v44, %v932_v55  ;;  %v906_v5 = vpop.f32.mrf.mxu3 }
 0x114   :  { %v965_v33 = vmul.f32 %v961_v3, %v930_v25  ;;  %v907_v34 = vadd.f32 %v906_v5, %v858_v4 }
 0x115   :  { %v934_v56 = vmul.f32 0.5, %v933_v26 }
 0x116   :  { %v973_v2 = vmul.f32 %v993_v45, %v965_v33  ;;  %v916_v61 = vsub.f32 %v907_v34, %v912_v49 }
 0x117   :  { %v935_v10 = vsub.f32 1.5, %v934_v56 }
 0x118   :  { %v1000_v11 = vpop.eup %999  ;;  %v981_v41 = vadd.f32 %v994_v9, %v973_v2  ;;  %v920_v17 = vadd.f32 1e-05, %v916_v61 }
 0x119   :  { %v936_v48 = vmul.f32 %v998_v44, %v935_v10  ;;  %v942_v20 = vmul.f32 %v1000_v11, %v919_v29  ;;  %vm948_vm6 = vweird.f32 %v1000_v11 }
 0x11a   :  { %985 = vst [vmem:[%s1641_s4] sm:$0xff] %v981_v41  ;;  %1001 = vrsqrt.f32 %v920_v17  ;;  %vm949_vm8 = vmor %vm947_vm7, %vm948_vm6  ;;  %vm957_vm10 = vweird.f32 %v920_v17 }
 0x11b   :  { %v940_v27 = vsel %vm939_vm5, %v998_v44, %v936_v48  ;;  %v943_v35 = vmul.f32 %v1000_v11, %v942_v20 }
 0x11c   :  { %v966_v40 = vmul.f32 %v962_v22, %v940_v27 }
 0x11d   :  { %v944_v51 = vmul.f32 0.5, %v943_v35 }
 0x11e   :  { %v974_v46 = vmul.f32 %v993_v45, %v966_v40 }
 0x11f   :  { %v945_v54 = vsub.f32 1.5, %v944_v51 }
 0x120   :  { %v1002_v58 = vpop.eup %1001  ;;  %v982_v0 = vadd.f32 %v994_v9, %v974_v46 }
 0x121   :  { %v946_v39 = vmul.f32 %v1000_v11, %v945_v54  ;;  %v952_v62 = vmul.f32 %v1002_v58, %v920_v17  ;;  %vm958_vm9 = vweird.f32 %v1002_v58 }
 0x122   :  { %986 = vst [vmem:[%s1641_s4 + $0x8] sm:$0xff] %v982_v0  ;;  %vm959_vm11 = vmor %vm957_vm10, %vm958_vm9 }
 0x123   :  { %v950_v21 = vsel %vm949_vm8, %v1000_v11, %v946_v39  ;;  %v953_v28 = vmul.f32 %v1002_v58, %v952_v62 }
 0x124   :  { %v967_v14 = vmul.f32 %v963_v31, %v950_v21 }
 0x125   :  { %v954_v12 = vmul.f32 0.5, %v953_v28 }
 0x126   :  { %v975_v15 = vmul.f32 %v993_v45, %v967_v14 }
 0x127   :  { %v955_v57 = vsub.f32 1.5, %v954_v12 }
 0x128   :  { %v983_v6 = vadd.f32 %v994_v9, %v975_v15 }
 0x129   :  { %v956_v8 = vmul.f32 %v1002_v58, %v955_v57 }
 0x12a   :  { %987 = vst [vmem:[%s1641_s4 + $0x10] sm:$0xff] %v983_v6 }
 0x12b   :  { %v960_v1 = vsel %vm959_vm11, %v1002_v58, %v956_v8 }
 0x12c   :  { %v968_v47 = vmul.f32 %v964_v42, %v960_v1 }
 0x12e   :  { %v976_v7 = vmul.f32 %v993_v45, %v968_v47 }
 0x130   :  { %v984_v13 = vadd.f32 %v994_v9, %v976_v7 }
 0x132   :  { %988 = vst [vmem:[%s1641_s4 + $0x18] sm:$0xff] %v984_v13 }

</bundles_post_ra>
